<compile_context>
chip_gen: v6e
topology: v6e:2x2x1
jax: 0.10.0
libtpu: 0.0.40
codegen_flags: <defaults>
</compile_context>

<pallas_src>
import functools

import numpy as np
import jax
import jax.numpy as jnp
from jax import lax
from jax.experimental import pallas as pl
from jax.experimental.pallas import tpu as pltpu


def _round_up(x, m):
    return ((x + m - 1) // m) * m


def _cdiv(a, b):
    return -(-a // b)


def _groupsum_kernel(x_ref, g_ref, o_ref, acc_ref, *,
                     d, td, inv_tau, precision, d_ragged):
    # x_ref: (TB, TD) tile of features, g_ref: (TD, k) one-hot group matrix,
    # o_ref: (TB, k), acc_ref: (TB, k) f32 accumulator.
    j = pl.program_id(1)
    last = pl.num_programs(1) - 1

    @pl.when(j == 0)
    def _():
        acc_ref[...] = jnp.zeros_like(acc_ref)

    def accum(xv):
        acc_ref[...] += jnp.dot(
            xv, g_ref[...],
            preferred_element_type=jnp.float32,
            precision=precision,
        )

    if d_ragged:
        # Only the tail D-tile pays the masking cost; other tiles take the
        # plain path.  Masking is required because OOB lanes may hold NaN/Inf
        # and 0 * NaN = NaN even though G's padded rows are zero.
        @pl.when(j != last)
        def _():
            accum(x_ref[...])

        @pl.when(j == last)
        def _():
            col = j * td + lax.broadcasted_iota(jnp.int32, (1, td), 1)
            accum(jnp.where(col < d, x_ref[...], 0))
    else:
        accum(x_ref[...])

    @pl.when(j == last)
    def _():
        o_ref[...] = (acc_ref[...] * inv_tau).astype(o_ref.dtype)


def group_sum(x, k, tau=1.0):
    """Pallas implementation of GroupSum.forward: x.view(..., k, -1).sum(-1) / tau."""
    *lead, D = x.shape
    assert D % k == 0, "last dim must be divisible by k"
    n = D // k
    B = int(np.prod(lead)) if lead else 1
    x2 = x.reshape(B, D)

    itemsize = jnp.dtype(x.dtype).itemsize
    # Sublane multiple for the dtype (8 for f32, 16 for bf16, 32 for int8).
    sub = max(8, 32 // itemsize)

    # --- Row tiling: cap TB and guarantee >=2 row tiles when splittable so the
    #     "parallel" axis feeds both v7x TensorCores. -------------------------
    TB = min(256, _round_up(B, sub))
    if B <= 256 and B > sub:
        TB = _round_up(_cdiv(B, 2), sub)

    # --- Feature tiling: ~8 MiB per-step budget shared between the x tile and
    #     the G tile; TD auto-scales so halving TB doubles TD. ----------------
    TILE_BYTES = 8 << 20
    td_budget = max(128, (TILE_BYTES // ((TB + k) * itemsize)) // 128 * 128)
    if D <= td_budget:
        TD = D                      # single D tile; full-dim block is always legal
    else:
        TD = td_budget              # multiple of 128
    d_ragged = (D % TD) != 0

    grid = (_cdiv(B, TB), _cdiv(D, TD))

    # One-hot group matrix, zero-padded to a whole number of TD tiles so its
    # blocks never read out of bounds (padded rows are all-zero -> no-op).
    Dg = grid[1] * TD
    gid = jnp.arange(Dg, dtype=jnp.int32) // n
    g_mat = (gid[:, None] == jnp.arange(k, dtype=jnp.int32)[None, :]).astype(x.dtype)

    # Pin MXU precision for f32 so x is not silently truncated to bf16.
    precision = lax.Precision.HIGHEST if (jnp.issubdtype(x.dtype, jnp.floating)
                                          and itemsize >= 4) else None

    cost = pl.CostEstimate(
        flops=2 * B * D * k,
        transcendentals=0,
        bytes_accessed=B * D * itemsize + grid[0] * Dg * k * itemsize
        + B * k * itemsize,
    )

    kernel = functools.partial(
        _groupsum_kernel,
        d=D, td=TD, inv_tau=float(1.0 / tau),
        precision=precision, d_ragged=d_ragged,
    )

    out = pl.pallas_call(
        kernel,
        out_shape=jax.ShapeDtypeStruct((B, k), x.dtype),
        grid_spec=pltpu.PrefetchScalarGridSpec(
            num_scalar_prefetch=0,
            grid=grid,
            in_specs=[
                pl.BlockSpec((TB, TD), lambda i, j: (i, j)),   # x tile
                pl.BlockSpec((TD, k), lambda i, j: (j, 0)),    # G tile (row-tile invariant)
            ],
            out_specs=pl.BlockSpec((TB, k), lambda i, j: (i, 0)),
            scratch_shapes=[pltpu.VMEM((TB, k), jnp.float32)],
        ),
        compiler_params=pltpu.CompilerParams(
            dimension_semantics=("parallel", "arbitrary"),
            vmem_limit_bytes=48 << 20,
        ),
        cost_estimate=cost,
    )(x2, g_mat)

    return out.reshape(*lead, k)


if __name__ == "__main__":
    key = jax.random.PRNGKey(0)

    # GroupSum module params (deterministic, set in-script)
    k = 4
    tau = 2.0

    # Example input consistent with the forward: trailing dim = k * n
    x = jax.random.normal(key, (2, 4, 64), dtype=jnp.float32)
    y = jax.block_until_ready(group_sum(x, k, tau))
    y_ref = x.reshape(*x.shape[:-1], k, -1).sum(-1) / tau
    np.testing.assert_allclose(np.asarray(y), np.asarray(y_ref),
                               rtol=1e-5, atol=1e-5)
    assert y.shape == (2, 4, k)

    # A second small case exercising ragged rows (B not a multiple of 8) and
    # the 2-way row split used for v7x megacore.
    k2, tau2 = 5, 1.0
    x2 = jax.random.normal(jax.random.PRNGKey(1), (3, 5, 40), dtype=jnp.float32)
    y2 = jax.block_until_ready(group_sum(x2, k2, tau2))
    y2_ref = x2.reshape(*x2.shape[:-1], k2, -1).sum(-1) / tau2
    np.testing.assert_allclose(np.asarray(y2), np.asarray(y2_ref),
                               rtol=1e-5, atol=1e-5)

    print("KERNEL_OK")
</pallas_src>

<mosaic_0001>
module attributes {stable_mosaic.version = 11 : i64} {
  func.func @_groupsum_kernel(%arg0: i32, %arg1: i32, %arg2: memref<8x64xf32, #tpu.memory_space<vmem>>, %arg3: memref<64x4xf32, #tpu.memory_space<vmem>>, %arg4: memref<8x4xf32, #tpu.memory_space<vmem>>, %arg5: memref<8x4xf32, #tpu.memory_space<vmem>>) attributes {dimension_semantics = [#tpu.dimension_semantics<parallel>, #tpu.dimension_semantics<arbitrary>], iteration_bounds = array<i64: 1, 1>, scalar_prefetch = 0 : i64, scratch_operands = 1 : i64, tpu.core_type = #tpu.core_type<tc>, window_params = [{transform_indices = @transform_0, window_bounds = array<i64: 8, 64>}, {transform_indices = @transform_1, window_bounds = array<i64: 64, 4>}, {transform_indices = @transform_2, window_bounds = array<i64: 8, 4>}]} {
    %c0_i32 = arith.constant 0 : i32
    %0 = arith.cmpi eq, %arg1, %c0_i32 : i32
    %1 = arith.extui %0 : i1 to i32
    %c0_i32_0 = arith.constant 0 : i32
    %2 = arith.cmpi ne, %1, %c0_i32_0 : i32
    scf.if %2 {
      %cst_10 = arith.constant 0.000000e+00 : f32
      %12 = vector.broadcast %cst_10 : f32 to vector<8x4xf32>
      %c0_11 = arith.constant 0 : index
      %c0_12 = arith.constant 0 : index
      %13 = vector.load %arg5[%c0_11, %c0_12] : memref<8x4xf32, #tpu.memory_space<vmem>>, vector<8x4xf32>
      tpu.vector_store %arg5[%c0_11, %c0_12], %12 {strides = array<i32>} : memref<8x4xf32, #tpu.memory_space<vmem>>, vector<8x4xf32>,
    } else {
    }
    %c0 = arith.constant 0 : index
    %c0_1 = arith.constant 0 : index
    %3 = vector.load %arg2[%c0, %c0_1] : memref<8x64xf32, #tpu.memory_space<vmem>>, vector<8x64xf32>
    %c0_2 = arith.constant 0 : index
    %c0_3 = arith.constant 0 : index
    %4 = vector.load %arg5[%c0_2, %c0_3] : memref<8x4xf32, #tpu.memory_space<vmem>>, vector<8x4xf32>
    %c0_4 = arith.constant 0 : index
    %c0_5 = arith.constant 0 : index
    %5 = vector.load %arg3[%c0_4, %c0_5] : memref<64x4xf32, #tpu.memory_space<vmem>>, vector<64x4xf32>
    %cst = arith.constant dense<0.000000e+00> : vector<8x4xf32>
    %6 = tpu.matmul %3, %5, %cst {dimension_numbers = #tpu.dot_dimension_numbers<[1], [0], [0], [1], [0, 0, 1, 1], [], []>, precision = #tpu.contract_precision<fp32>} : vector<8x64xf32>, vector<64x4xf32>, vector<8x4xf32> -> vector<8x4xf32>
    %7 = arith.addf %4, %6 : vector<8x4xf32>
    %c0_6 = arith.constant 0 : index
    %c0_7 = arith.constant 0 : index
    %8 = vector.load %arg5[%c0_6, %c0_7] : memref<8x4xf32, #tpu.memory_space<vmem>>, vector<8x4xf32>
    tpu.vector_store %arg5[%c0_6, %c0_7], %7 {strides = array<i32>} : memref<8x4xf32, #tpu.memory_space<vmem>>, vector<8x4xf32>,
    %c0_i32_8 = arith.constant 0 : i32
    %9 = arith.cmpi eq, %arg1, %c0_i32_8 : i32
    %10 = arith.extui %9 : i1 to i32
    %c0_i32_9 = arith.constant 0 : i32
    %11 = arith.cmpi ne, %10, %c0_i32_9 : i32
    scf.if %11 {
      %c0_10 = arith.constant 0 : index
      %c0_11 = arith.constant 0 : index
      %12 = vector.load %arg5[%c0_10, %c0_11] : memref<8x4xf32, #tpu.memory_space<vmem>>, vector<8x4xf32>
      %cst_12 = arith.constant 5.000000e-01 : f32
      %13 = vector.broadcast %cst_12 : f32 to vector<8x4xf32>
      %14 = arith.mulf %12, %13 : vector<8x4xf32>
      %c0_13 = arith.constant 0 : index
      %c0_14 = arith.constant 0 : index
      %15 = vector.load %arg4[%c0_13, %c0_14] : memref<8x4xf32, #tpu.memory_space<vmem>>, vector<8x4xf32>
      tpu.vector_store %arg4[%c0_13, %c0_14], %14 {strides = array<i32>} : memref<8x4xf32, #tpu.memory_space<vmem>>, vector<8x4xf32>,
    } else {
    }
    return
  }
  func.func @transform_0(%arg0: i32, %arg1: i32) -> (i32, i32) {
    %c0_i32 = arith.constant 0 : i32
    return %arg0, %arg1 : i32, i32
  }
  func.func @transform_1(%arg0: i32, %arg1: i32) -> (i32, i32) {
    %c0_i32 = arith.constant 0 : i32
    %c0_i32_0 = arith.constant 0 : i32
    return %arg1, %c0_i32 : i32, i32
  }
  func.func @transform_2(%arg0: i32, %arg1: i32) -> (i32, i32) {
    %c0_i32 = arith.constant 0 : i32
    %c0_i32_0 = arith.constant 0 : i32
    return %arg0, %c0_i32 : i32, i32
  }
}

</mosaic_0001>

<bundles_post_ra>
// kernel: tpu_custom_call.1
= control target key start
LH: loop header
LB: loop body
LE: loop exit
PB: predicated region body
PF: predicated region fallthrough
CT: control target
= control target key end

     0   :  { %v751_v0 = vmov 0.0   ;;  %vm27_vm0 = vcmask 523264   ;;  %vm752_vm1 = vmmov 0   ;;  %vm15_vm2 = vcmask 31744   ;;  %s998_s1 = inlined_call_operand.vmem [shape: f32[64,4], index: 1, kind: input, shape index: {}]   ;;  %s999_s0 = inlined_call_operand.vmem [shape: f32[8,64], index: 0, kind: input, shape index: {}]   ;;  %s1000_s2 = inlined_call_operand.vmem [shape: f32[8,4], index: 2, kind: output, shape index: {}]  }
   0x1   :  { %635 = vmatprep.subr.mxu0 %v751_v0  ;;  %v26_v1 = vld [vmem:[%s998_s1 + $0x38] sm:$0xff]  ;;  %v25_v2 = vld [vmem:[%s998_s1 + $0x30] sm:$0xff]  ;;  %v24_v3 = vld [vmem:[%s998_s1 + $0x28] sm:$0xff]  ;;  %654 = vmatprep.subr.mxu1 %v751_v0  ;;  %16 = vst.msk [vmem:[#allocation2] sm:$0xff] %vm15_vm2, %v751_v0 }
   0x2   :  { %v779_v4 = vand.u32 4294901760, %v26_v1  ;;  %v781_v5 = vand.u32 4294901760, %v25_v2  ;;  %v783_v6 = vand.u32 4294901760, %v24_v3  ;;  %v23_v7 = vld [vmem:[%s998_s1 + $0x20] sm:$0xff]  ;;  %v22_v8 = vld [vmem:[%s998_s1 + $0x18] sm:$0xff]  ;;  %v21_v9 = vld [vmem:[%s998_s1 + $0x10] sm:$0xff]  ;;  %651 = vmatprep.mubr.msk.f32.mxu0 %vm752_vm1, %v751_v0  ;;  %670 = vmatprep.mubr.msk.f32.mxu1 %vm752_vm1, %v751_v0 }
   0x3   :  { %v798_v10 = vand.u32 4294901760, %v23_v7  ;;  %v800_v11 = vand.u32 4294901760, %v22_v8  ;;  %v802_v12 = vand.u32 4294901760, %v21_v9  ;;  %v20_v13 = vld [vmem:[%s998_s1 + $0x8] sm:$0xff]  ;;  %v19_v14 = vld [vmem:[%s998_s1] sm:$0xff] }
   0x4   :  { %v17_v15 = vld [vmem:[%s999_s0] sm:$0xff]  ;;  %636 = vmatpush3.msra.mxu0 %v779_v4  ;;  %v815_v16 = vsub.f32 %v26_v1, %v779_v4  ;;  %v818_v17 = vsub.f32 %v25_v2, %v781_v5  ;;  %v820_v18 = vand.u32 4294901760, %v20_v13  ;;  %v823_v19 = vsub.f32 %v24_v3, %v783_v6 }
   0x5   :  { %637 = vmatprep.subr.mxu0 %v751_v0  ;;  %v826_v20 = vand.u32 4294901760, %v19_v14  ;;  %v829_v21 = vsub.f32 %v23_v7, %v798_v10  ;;  %v29_v22 = vsel %vm27_vm0, %v17_v15, 0  ;;  %v833_v23 = vsub.f32 %v22_v8, %v800_v11 }
   0x6   :  { %638 = vmatpush3.msra.mxu0 %v781_v5  ;;  %v133_v24 = vand.u32 4294901760, %v815_v16  ;;  %v140_v25 = vand.u32 4294901760, %v818_v17  ;;  %v147_v26 = vand.u32 4294901760, %v823_v19  ;;  %v839_v27 = vand.u32 4294901760, %v29_v22 }
   0x7   :  { %639 = vmatprep.subr.mxu0 %v751_v0  ;;  %v154_v28 = vand.u32 4294901760, %v829_v21  ;;  %v161_v29 = vand.u32 4294901760, %v833_v23  ;;  %v845_v30 = vsub.f32 %v21_v9, %v802_v12  ;;  %v848_v31 = vsub.f32 %v20_v13, %v820_v18 }
   0x8   :  { %640 = vmatpush3.msra.mxu0 %v783_v6  ;;  %v134_v32 = vsub.f32 %v815_v16, %v133_v24  ;;  %v141_v33 = vsub.f32 %v818_v17, %v140_v25  ;;  %v148_v34 = vsub.f32 %v823_v19, %v147_v26  ;;  %v861_v35 = vsub.f32 %v29_v22, %v839_v27  ;;  %v18_v7 = vld [vmem:[#allocation2] sm:$0xff] }
   0x9   :  { %641 = vmatprep.subr.mxu0 %v751_v0  ;;  %v155_v36 = vsub.f32 %v829_v21, %v154_v28  ;;  %v168_v40 = vand.u32 4294901760, %v845_v30  ;;  %v162_v41 = vsub.f32 %v833_v23, %v161_v29  ;;  %v175_v44 = vand.u32 4294901760, %v848_v31 }
   0xa   :  { %642 = vmatpush3.msra.mxu0 %v798_v10  ;;  %v135_v37 = vand.u32 4294901760, %v134_v32  ;;  %v142_v38 = vand.u32 4294901760, %v141_v33  ;;  %v106_v39 = vand.u32 4294901760, %v861_v35  ;;  %v149_v42 = vand.u32 4294901760, %v148_v34 }
   0xb   :  { %643 = vmatprep.subr.mxu0 %v751_v0  ;;  %v880_v45 = vsub.f32 %v19_v14, %v826_v20  ;;  %v156_v46 = vand.u32 4294901760, %v155_v36  ;;  %v169_v47 = vsub.f32 %v845_v30, %v168_v40  ;;  %v163_v50 = vand.u32 4294901760, %v162_v41 }
   0xc   :  { %644 = vmatpush3.msra.mxu0 %v800_v11  ;;  %655 = vmatpush3.msra.mxu1 %v135_v37  ;;  %v107_v43 = vsub.f32 %v861_v35, %v106_v39  ;;  %v176_v51 = vsub.f32 %v848_v31, %v175_v44 }
   0xd   :  { %645 = vmatprep.subr.mxu0 %v751_v0  ;;  %656 = vmatprep.subr.mxu1 %v751_v0  ;;  %v182_v48 = vand.u32 4294901760, %v880_v45  ;;  %v170_v52 = vand.u32 4294901760, %v169_v47 }
   0xe   :  { %646 = vmatpush3.msra.mxu0 %v802_v12  ;;  %657 = vmatpush3.msra.mxu1 %v142_v38  ;;  %v108_v49 = vand.u32 4294901760, %v107_v43  ;;  %v177_v54 = vand.u32 4294901760, %v176_v51 }
   0xf   :  { %647 = vmatprep.subr.mxu0 %v751_v0  ;;  %658 = vmatprep.subr.mxu1 %v751_v0  ;;  %v183_v53 = vsub.f32 %v880_v45, %v182_v48 }
  0x10   :  { %648 = vmatpush3.msra.mxu0 %v820_v18  ;;  %659 = vmatpush3.msra.mxu1 %v149_v42 }
  0x11   :  { %649 = vmatprep.subr.mxu0 %v751_v0  ;;  %660 = vmatprep.subr.mxu1 %v751_v0  ;;  %v184_v55 = vand.u32 4294901760, %v183_v53 }
  0x12   :  { %650 = vmatpush3.msra.mxu0 %v826_v20  ;;  %661 = vmatpush3.msra.mxu1 %v156_v46 }
  0x13   :  { %662 = vmatprep.subr.mxu1 %v751_v0  ;;  %673 = vmatprep.subr.mxu0 %v751_v0 }
  0x14   :  { %652 = vmatmul.mubr.f32.vlgmr.msra.gmra.mxu0 %v108_v49  ;;  %663 = vmatpush3.msra.mxu1 %v163_v50 }
  0x15   :  { %674 = vmatpush3.msra.mxu0 %v815_v16  ;;  %664 = vmatprep.subr.mxu1 %v751_v0 }
  0x16   :  { %675 = vmatprep.subr.mxu0 %v751_v0  ;;  %665 = vmatpush3.msra.mxu1 %v170_v52 }
  0x17   :  { %676 = vmatpush3.msra.mxu0 %v818_v17  ;;  %666 = vmatprep.subr.mxu1 %v751_v0 }
  0x18   :  { %677 = vmatprep.subr.mxu0 %v751_v0  ;;  %667 = vmatpush3.msra.mxu1 %v177_v54 }
  0x19   :  { %678 = vmatpush3.msra.mxu0 %v823_v19  ;;  %668 = vmatprep.subr.mxu1 %v751_v0 }
  0x1a   :  { %679 = vmatprep.subr.mxu0 %v751_v0  ;;  %669 = vmatpush3.msra.mxu1 %v184_v55 }
  0x1b   :  { %680 = vmatpush3.msra.mxu0 %v829_v21  ;;  %671 = vmatmul.mubr.f32.vlgmr.msra.gmra.mxu1 %v839_v27 }
  0x1c   :  { %681 = vmatprep.subr.mxu0 %v751_v0  ;;  %692 = vmatprep.subr.mxu1 %v751_v0 }
  0x1d   :  { %682 = vmatpush3.msra.mxu0 %v833_v23  ;;  %693 = vmatpush3.msra.mxu1 %v779_v4 }
  0x1e   :  { %683 = vmatprep.subr.mxu0 %v751_v0  ;;  %694 = vmatprep.subr.mxu1 %v751_v0 }
  0x1f   :  { %684 = vmatpush3.msra.mxu0 %v845_v30  ;;  %695 = vmatpush3.msra.mxu1 %v781_v5 }
  0x20   :  { %685 = vmatprep.subr.mxu0 %v751_v0  ;;  %696 = vmatprep.subr.mxu1 %v751_v0 }
  0x21   :  { %686 = vmatpush3.msra.mxu0 %v848_v31  ;;  %697 = vmatpush3.msra.mxu1 %v783_v6 }
  0x22   :  { %687 = vmatprep.subr.mxu0 %v751_v0  ;;  %698 = vmatprep.subr.mxu1 %v751_v0 }
  0x23   :  { %688 = vmatpush3.msra.mxu0 %v880_v45  ;;  %689 = vmatprep.mubr.msk.f32.mxu0 %vm752_vm1, %v751_v0 }
  0x24   :  { %699 = vmatpush3.msra.mxu1 %v798_v10  ;;  %690 = vmatmul.mubr.f32.vlgmr.msra.gmra.mxu0 %v861_v35 }
  0x25   :  { %700 = vmatprep.subr.mxu1 %v751_v0  ;;  %711 = vmatprep.subr.mxu0 %v751_v0 }
  0x26   :  { %701 = vmatpush3.msra.mxu1 %v800_v11  ;;  %712 = vmatpush3.msra.mxu0 %v133_v24 }
  0x27   :  { %702 = vmatprep.subr.mxu1 %v751_v0  ;;  %713 = vmatprep.subr.mxu0 %v751_v0 }
  0x28   :  { %703 = vmatpush3.msra.mxu1 %v802_v12  ;;  %714 = vmatpush3.msra.mxu0 %v140_v25 }
  0x29   :  { %704 = vmatprep.subr.mxu1 %v751_v0  ;;  %715 = vmatprep.subr.mxu0 %v751_v0 }
  0x2a   :  { %705 = vmatpush3.msra.mxu1 %v820_v18  ;;  %716 = vmatpush3.msra.mxu0 %v147_v26 }
  0x2b   :  { %706 = vmatprep.subr.mxu1 %v751_v0  ;;  %717 = vmatprep.subr.mxu0 %v751_v0 }
  0x2c   :  { %707 = vmatpush3.msra.mxu1 %v826_v20  ;;  %708 = vmatprep.mubr.msk.f32.mxu1 %vm752_vm1, %v751_v0 }
  0x2d   :  { %718 = vmatpush3.msra.mxu0 %v154_v28  ;;  %709 = vmatmul.mubr.f32.vlgmr.msra.gmra.mxu1 %v106_v39 }
  0x2e   :  { %719 = vmatprep.subr.mxu0 %v751_v0  ;;  %730 = vmatprep.subr.mxu1 %v751_v0 }
  0x2f   :  { %720 = vmatpush3.msra.mxu0 %v161_v29  ;;  %731 = vmatpush3.msra.mxu1 %v779_v4 }
  0x30   :  { %721 = vmatprep.subr.mxu0 %v751_v0  ;;  %732 = vmatprep.subr.mxu1 %v751_v0 }
  0x31   :  { %722 = vmatpush3.msra.mxu0 %v168_v40  ;;  %733 = vmatpush3.msra.mxu1 %v781_v5 }
  0x32   :  { %723 = vmatprep.subr.mxu0 %v751_v0  ;;  %734 = vmatprep.subr.mxu1 %v751_v0 }
  0x33   :  { %724 = vmatpush3.msra.mxu0 %v175_v44  ;;  %735 = vmatpush3.msra.mxu1 %v783_v6 }
  0x34   :  { %725 = vmatprep.subr.mxu0 %v751_v0  ;;  %736 = vmatprep.subr.mxu1 %v751_v0 }
  0x35   :  { %726 = vmatpush3.msra.mxu0 %v182_v48  ;;  %727 = vmatprep.mubr.msk.f32.mxu0 %vm752_vm1, %v751_v0 }
  0x36   :  { %737 = vmatpush3.msra.mxu1 %v798_v10  ;;  %728 = vmatmul.mubr.f32.vlgmr.msra.gmra.mxu0 %v839_v27 }
  0x37   :  { %738 = vmatprep.subr.mxu1 %v751_v0  ;;  %746 = vmatprep.mubr.msk.f32.mxu1 %vm752_vm1, %v751_v0 }
  0x38   :  { %739 = vmatpush3.msra.mxu1 %v800_v11 }
  0x39   :  { %740 = vmatprep.subr.mxu1 %v751_v0 }
  0x3a   :  { %741 = vmatpush3.msra.mxu1 %v802_v12 }
  0x3b   :  { %742 = vmatprep.subr.mxu1 %v751_v0 }
  0x3c   :  { %743 = vmatpush3.msra.mxu1 %v820_v18 }
  0x3d   :  { %744 = vmatprep.subr.mxu1 %v751_v0 }
  0x3e   :  { %745 = vmatpush3.msra.mxu1 %v826_v20 }
  0x3f   :  { %747 = vmatmul.mubr.f32.vlgmr.msra.gmra.mxu1 %v839_v27 }
  0xd4   :  { %v110_v56 = vpop.f32.mrf.mxu0 }
  0xd6   :  { %v653_v57 = vpop.f32.mrf.mxu0 }
  0xdb   :  { %v221_v58 = vpop.f32.mrf.mxu1 }
  0xdc   :  { %v222_v2 = vadd.f32 %v221_v58, %v110_v56 }
  0xdd   :  { %v672_v59 = vpop.f32.mrf.mxu1 }
  0xe4   :  { %v309_v60 = vpop.f32.mrf.mxu0 }
  0xe5   :  { %v310_v4 = vadd.f32 %v309_v60, %v222_v2 }
  0xe6   :  { %v691_v61 = vpop.f32.mrf.mxu0 }
  0xed   :  { %v390_v62 = vpop.f32.mrf.mxu1 }
  0xee   :  { %v391_v5 = vadd.f32 %v390_v62, %v310_v4 }
  0xef   :  { %v710_v63 = vpop.f32.mrf.mxu1 }
  0xf6   :  { %v485_v1 = vpop.f32.mrf.mxu0 }
  0xf7   :  { %v486_v6 = vadd.f32 %v485_v1, %v391_v5 }
  0xf8   :  { %v729_v3 = vpop.f32.mrf.mxu0 }
  0xff   :  { %v564_v8 = vpop.f32.mrf.mxu1 }
 0x100   :  { %v565_v9 = vadd.f32 %v564_v8, %v486_v6 }
 0x101   :  { %v748_v10 = vpop.f32.mrf.mxu1 }
 0x102   :  { %v568_v11 = vadd.f32 %v565_v9, %v18_v7 }
 0x104   :  { %570 = vst.msk [vmem:[#allocation2] sm:$0xff] %vm15_vm2, %v568_v11 }
 0x10b   :  { %v574_v0 = vld [vmem:[#allocation2] sm:$0xff] }
 0x10c   :  { %v575_v12 = vmul.f32 0.5, %v574_v0 }
 0x10e   :  { %576 = vst.msk [vmem:[%s1000_s2] sm:$0xff] %vm15_vm2, %v575_v12 }

</bundles_post_ra>
